<compile_context>
chip_gen: v7x
topology: tpu7x:2x2x1
jax: 0.10.0
libtpu: 0.0.40
codegen_flags: <defaults>
</compile_context>

<pallas_src>
import functools

import jax
import jax.numpy as jnp
from jax import lax
from jax.experimental import pallas as pl
from jax.experimental.pallas import tpu as pltpu


def _round_up(x, m):
    return (x + m - 1) // m * m


def _channel_wise_kernel(p_ref, w1_ref, w2_ref, g_ref, b_ref, o_ref, *, eps, inv_m):
    """One batch sample: patches @ W1 -> @ W2 -> LayerNorm(spatial) -> affine."""
    # Conv1 (2x2, stride 2) as a space-to-depth matmul on the MXU.
    y1 = jnp.dot(p_ref[...], w1_ref[...], preferred_element_type=jnp.float32)
    # Conv2 (1x1) as a second MXU matmul; operands in the MXU dtype, f32 acc.
    y2 = jnp.dot(y1.astype(w2_ref.dtype), w2_ref[...],
                 preferred_element_type=jnp.float32)              # (Mp, Cp) f32
    # LayerNorm over spatial rows, per channel column: one-pass stats
    # (sum + sum-of-squares -> mean/var), fused normalize + affine.
    s1 = jnp.sum(y2, axis=0, keepdims=True)                       # (1, Cp)
    s2 = jnp.sum(y2 * y2, axis=0, keepdims=True)                  # (1, Cp)
    mean = s1 * inv_m
    var = jnp.maximum(s2 * inv_m - mean * mean, 0.0)
    y_hat = (y2 - mean) * lax.rsqrt(var + eps)                    # EUP rsqrt
    # gamma/beta are per spatial position -> (Mp, 1) column broadcasts.
    o_ref[...] = g_ref[...] * y_hat + b_ref[...]


@functools.partial(jax.jit, static_argnames=("eps", "mxu_dtype"))
def channel_wise_forward(x_nchw, w1, w2, gamma, beta, *, eps=1e-5,
                         mxu_dtype=jnp.float32):
    """Forward of Channel_wise. Conv biases are omitted on purpose: they are
    exactly cancelled by the LayerNorm mean subtraction over the spatial axis."""
    N, Cin, H, W = x_nchw.shape
    Cout = w1.shape[0]
    assert H % 2 == 0 and W % 2 == 0, "kernel=2/stride=2 expects even H, W"
    OH, OW = H // 2, W // 2
    Mp = OH * OW                      # rows per sample (spatial, sublane axis)
    K1 = 4 * Cin                      # 2*2*Cin contraction for conv1
    K1p = _round_up(K1, 128)          # aligned, unmasked MXU feed
    Cp = _round_up(Cout, 128)         # lane-dense channel axis

    # --- host glue: space-to-depth "im2col" (pure reshape, no replication) ---
    x = jnp.transpose(x_nchw, (0, 2, 3, 1)).astype(jnp.float32)   # NHWC (boundary only)
    x = x.reshape(N, OH, 2, OW, 2, Cin)
    x = jnp.transpose(x, (0, 1, 3, 2, 4, 5))                      # (N, OH, OW, kh, kw, Cin)
    patches = x.reshape(N, Mp, K1)
    patches = jnp.pad(patches, ((0, 0), (0, 0), (0, K1p - K1))).astype(mxu_dtype)

    # conv1 weight (Cout, Cin, 2, 2) -> (kh, kw, Cin, Cout) -> (K1p, Cp), zero-padded.
    w1m = jnp.transpose(w1, (2, 3, 1, 0)).reshape(K1, Cout).astype(jnp.float32)
    w1m = jnp.pad(w1m, ((0, K1p - K1), (0, Cp - Cout))).astype(mxu_dtype)

    # conv2 weight (Cout, Cout, 1, 1): y2[:, co] = sum_ci y1[:, ci] * w2[co, ci]
    w2m = jnp.transpose(w2.reshape(Cout, Cout), (1, 0)).astype(jnp.float32)
    w2m = jnp.pad(w2m, ((0, Cp - Cout), (0, Cp - Cout))).astype(mxu_dtype)

    # LayerNorm affine over (OH, OW) -> per-spatial-row column vectors (f32).
    g_col = gamma.reshape(Mp, 1).astype(jnp.float32)
    b_col = beta.reshape(Mp, 1).astype(jnp.float32)

    kernel = functools.partial(_channel_wise_kernel, eps=eps, inv_m=1.0 / Mp)

    out = pl.pallas_call(
        kernel,
        out_shape=jax.ShapeDtypeStruct((N, Mp, Cp), jnp.float32),
        grid_spec=pltpu.PrefetchScalarGridSpec(
            num_scalar_prefetch=0,
            grid=(N,),
            in_specs=[
                pl.BlockSpec((None, Mp, K1p), lambda n: (n, 0, 0)),   # patches (per sample)
                pl.BlockSpec((K1p, Cp), lambda n: (0, 0)),            # W1 (resident)
                pl.BlockSpec((Cp, Cp), lambda n: (0, 0)),             # W2 (resident)
                pl.BlockSpec((Mp, 1), lambda n: (0, 0)),              # gamma
                pl.BlockSpec((Mp, 1), lambda n: (0, 0)),              # beta
            ],
            out_specs=pl.BlockSpec((None, Mp, Cp), lambda n: (n, 0, 0)),
        ),
        compiler_params=pltpu.CompilerParams(
            dimension_semantics=("parallel",)),
    )(patches, w1m, w2m, g_col, b_col)

    # Slice off channel padding; back to NCHW only to match the PyTorch
    # interface (a full NHWC pipeline would drop this transpose).
    out = out[:, :, :Cout].reshape(N, OH, OW, Cout)
    return jnp.transpose(out, (0, 3, 1, 2))


def _reference(x, w1, b1, w2, b2, gamma, beta, eps=1e-5):
    """Pure-JAX reference (full f32): conv -> conv -> LayerNorm([OH, OW])."""
    y = lax.conv_general_dilated(
        x.astype(jnp.float32), w1.astype(jnp.float32), (2, 2), "VALID",
        dimension_numbers=("NCHW", "OIHW", "NCHW"),
        precision=lax.Precision.HIGHEST) + b1.reshape(1, -1, 1, 1)
    y = lax.conv_general_dilated(
        y, w2.astype(jnp.float32), (1, 1), "VALID",
        dimension_numbers=("NCHW", "OIHW", "NCHW"),
        precision=lax.Precision.HIGHEST) + b2.reshape(1, -1, 1, 1)
    mean = jnp.mean(y, axis=(2, 3), keepdims=True)
    var = jnp.mean((y - mean) ** 2, axis=(2, 3), keepdims=True)
    y_hat = (y - mean) * lax.rsqrt(var + eps)
    return gamma[None, None] * y_hat + beta[None, None]


if __name__ == "__main__":
    # Module config: Channel_wise(in_channels=4, out_channels=8, sizes=(8, 8))
    IN_C, OUT_C = 4, 8
    N, H, W = 2, 16, 16
    OH, OW = H // 2, W // 2

    key = jax.random.PRNGKey(0)
    kx, k1, kb1, k2, kb2, kg, kb = jax.random.split(key, 7)
    x = jax.random.normal(kx, (N, IN_C, H, W), dtype=jnp.float32)
    w1 = 0.1 * jax.random.normal(k1, (OUT_C, IN_C, 2, 2), dtype=jnp.float32)
    b1 = 0.1 * jax.random.normal(kb1, (OUT_C,), dtype=jnp.float32)
    w2 = 0.1 * jax.random.normal(k2, (OUT_C, OUT_C, 1, 1), dtype=jnp.float32)
    b2 = 0.1 * jax.random.normal(kb2, (OUT_C,), dtype=jnp.float32)
    gamma = 1.0 + 0.1 * jax.random.normal(kg, (OH, OW), dtype=jnp.float32)
    beta = 0.1 * jax.random.normal(kb, (OH, OW), dtype=jnp.float32)

    ref = _reference(x, w1, b1, w2, b2, gamma, beta)

    # f32 MXU path (bit-faithful to the PyTorch module; biases dropped because
    # LayerNorm's spatial mean subtraction cancels them exactly).
    out = channel_wise_forward(x, w1, w2, gamma, beta)
    out = jax.block_until_ready(out)
    assert out.shape == (N, OUT_C, OH, OW)
    assert jnp.allclose(out, ref, atol=5e-4, rtol=5e-4), \
        float(jnp.max(jnp.abs(out - ref)))

    # bf16 MXU-operand path (v6e/v7x fast path): tolerance sized for bf16
    # operand rounding amplified by the LayerNorm 1/sigma normalization.
    out_bf16 = channel_wise_forward(x, w1, w2, gamma, beta,
                                    mxu_dtype=jnp.bfloat16)
    out_bf16 = jax.block_until_ready(out_bf16)
    assert jnp.allclose(out_bf16, ref, atol=5e-2, rtol=5e-2), \
        float(jnp.max(jnp.abs(out_bf16 - ref)))

    print("KERNEL_OK")
</pallas_src>

<mosaic_0001>
module attributes {stable_mosaic.version = 11 : i64} {
  func.func @_channel_wise_kernel(%arg0: i32, %arg1: memref<1x64x128xf32, #tpu.memory_space<vmem>>, %arg2: memref<128x128xf32, #tpu.memory_space<vmem>>, %arg3: memref<128x128xf32, #tpu.memory_space<vmem>>, %arg4: memref<64x1xf32, #tpu.memory_space<vmem>>, %arg5: memref<64x1xf32, #tpu.memory_space<vmem>>, %arg6: memref<1x64x128xf32, #tpu.memory_space<vmem>>) attributes {dimension_semantics = [#tpu.dimension_semantics<parallel>], iteration_bounds = array<i64: 2>, scalar_prefetch = 0 : i64, scratch_operands = 0 : i64, tpu.core_type = #tpu.core_type<tc>, window_params = [{transform_indices = @transform_0, window_bounds = array<i64: 1, 64, 128>}, {pipeline_mode = #tpu.pipeline_mode<synchronous>, transform_indices = @transform_1, window_bounds = array<i64: 128, 128>}, {pipeline_mode = #tpu.pipeline_mode<synchronous>, transform_indices = @transform_2, window_bounds = array<i64: 128, 128>}, {pipeline_mode = #tpu.pipeline_mode<synchronous>, transform_indices = @transform_3, window_bounds = array<i64: 64, 1>}, {pipeline_mode = #tpu.pipeline_mode<synchronous>, transform_indices = @transform_4, window_bounds = array<i64: 64, 1>}, {transform_indices = @transform_5, window_bounds = array<i64: 1, 64, 128>}]} {
    %c0 = arith.constant 0 : index
    %c0_0 = arith.constant 0 : index
    %c0_1 = arith.constant 0 : index
    %0 = vector.load %arg1[%c0, %c0_0, %c0_1] : memref<1x64x128xf32, #tpu.memory_space<vmem>>, vector<1x64x128xf32>
    %1 = vector.shape_cast %0 : vector<1x64x128xf32> to vector<64x128xf32>
    %c0_2 = arith.constant 0 : index
    %c0_3 = arith.constant 0 : index
    %2 = vector.load %arg2[%c0_2, %c0_3] : memref<128x128xf32, #tpu.memory_space<vmem>>, vector<128x128xf32>
    %cst = arith.constant dense<0.000000e+00> : vector<64x128xf32>
    %3 = tpu.matmul %1, %2, %cst {dimension_numbers = #tpu.dot_dimension_numbers<[1], [0], [0], [1], [0, 0, 1, 1], [], []>} : vector<64x128xf32>, vector<128x128xf32>, vector<64x128xf32> -> vector<64x128xf32>
    %c0_4 = arith.constant 0 : index
    %c0_5 = arith.constant 0 : index
    %4 = vector.load %arg3[%c0_4, %c0_5] : memref<128x128xf32, #tpu.memory_space<vmem>>, vector<128x128xf32>
    %cst_6 = arith.constant dense<0.000000e+00> : vector<64x128xf32>
    %5 = tpu.matmul %3, %4, %cst_6 {dimension_numbers = #tpu.dot_dimension_numbers<[1], [0], [0], [1], [0, 0, 1, 1], [], []>} : vector<64x128xf32>, vector<128x128xf32>, vector<64x128xf32> -> vector<64x128xf32>
    %cst_7 = arith.constant dense<0.000000e+00> : vector<128xf32>
    %6 = vector.multi_reduction <add>, %5, %cst_7 [0] : vector<64x128xf32> to vector<128xf32>
    %7 = vector.shape_cast %6 : vector<128xf32> to vector<1x128xf32>
    %8 = arith.mulf %5, %5 : vector<64x128xf32>
    %cst_8 = arith.constant dense<0.000000e+00> : vector<128xf32>
    %9 = vector.multi_reduction <add>, %8, %cst_8 [0] : vector<64x128xf32> to vector<128xf32>
    %10 = vector.shape_cast %9 : vector<128xf32> to vector<1x128xf32>
    %cst_9 = arith.constant 1.562500e-02 : f32
    %11 = vector.broadcast %cst_9 : f32 to vector<1x128xf32>
    %12 = arith.mulf %7, %11 : vector<1x128xf32>
    %cst_10 = arith.constant 1.562500e-02 : f32
    %13 = vector.broadcast %cst_10 : f32 to vector<1x128xf32>
    %14 = arith.mulf %10, %13 : vector<1x128xf32>
    %15 = arith.mulf %12, %12 : vector<1x128xf32>
    %16 = arith.subf %14, %15 : vector<1x128xf32>
    %cst_11 = arith.constant 0.000000e+00 : f32
    %17 = vector.broadcast %cst_11 : f32 to vector<1x128xf32>
    %18 = arith.maximumf %16, %17 : vector<1x128xf32>
    %19 = vector.broadcast %12 : vector<1x128xf32> to vector<64x128xf32>
    %20 = arith.subf %5, %19 : vector<64x128xf32>
    %cst_12 = arith.constant 9.99999974E-6 : f32
    %21 = vector.broadcast %cst_12 : f32 to vector<1x128xf32>
    %22 = arith.addf %18, %21 : vector<1x128xf32>
    %23 = math.rsqrt %22 : vector<1x128xf32>
    %24 = vector.broadcast %23 : vector<1x128xf32> to vector<64x128xf32>
    %25 = arith.mulf %20, %24 : vector<64x128xf32>
    %c0_13 = arith.constant 0 : index
    %c0_14 = arith.constant 0 : index
    %26 = vector.load %arg4[%c0_13, %c0_14] : memref<64x1xf32, #tpu.memory_space<vmem>>, vector<64x1xf32>
    %27 = vector.broadcast %26 : vector<64x1xf32> to vector<64x128xf32>
    %28 = arith.mulf %27, %25 : vector<64x128xf32>
    %c0_15 = arith.constant 0 : index
    %c0_16 = arith.constant 0 : index
    %29 = vector.load %arg5[%c0_15, %c0_16] : memref<64x1xf32, #tpu.memory_space<vmem>>, vector<64x1xf32>
    %30 = vector.broadcast %29 : vector<64x1xf32> to vector<64x128xf32>
    %31 = arith.addf %28, %30 : vector<64x128xf32>
    %c0_17 = arith.constant 0 : index
    %c0_18 = arith.constant 0 : index
    %c0_19 = arith.constant 0 : index
    %32 = vector.load %arg6[%c0_17, %c0_18, %c0_19] : memref<1x64x128xf32, #tpu.memory_space<vmem>>, vector<1x64x128xf32>
    %33 = vector.shape_cast %32 : vector<1x64x128xf32> to vector<64x128xf32>
    %34 = vector.shape_cast %31 : vector<64x128xf32> to vector<1x64x128xf32>
    tpu.vector_store %arg6[%c0_17, %c0_18, %c0_19], %34 {strides = array<i32>} : memref<1x64x128xf32, #tpu.memory_space<vmem>>, vector<1x64x128xf32>,
    return
  }
  func.func @transform_0(%arg0: i32) -> (i32, i32, i32) {
    %c0_i32 = arith.constant 0 : i32
    %c0_i32_0 = arith.constant 0 : i32
    %c0_i32_1 = arith.constant 0 : i32
    return %arg0, %c0_i32, %c0_i32_0 : i32, i32, i32
  }
  func.func @transform_1(%arg0: i32) -> (i32, i32) {
    %c0_i32 = arith.constant 0 : i32
    %c0_i32_0 = arith.constant 0 : i32
    %c0_i32_1 = arith.constant 0 : i32
    return %c0_i32, %c0_i32_0 : i32, i32
  }
  func.func @transform_2(%arg0: i32) -> (i32, i32) {
    %c0_i32 = arith.constant 0 : i32
    %c0_i32_0 = arith.constant 0 : i32
    %c0_i32_1 = arith.constant 0 : i32
    return %c0_i32, %c0_i32_0 : i32, i32
  }
  func.func @transform_3(%arg0: i32) -> (i32, i32) {
    %c0_i32 = arith.constant 0 : i32
    %c0_i32_0 = arith.constant 0 : i32
    %c0_i32_1 = arith.constant 0 : i32
    return %c0_i32, %c0_i32_0 : i32, i32
  }
  func.func @transform_4(%arg0: i32) -> (i32, i32) {
    %c0_i32 = arith.constant 0 : i32
    %c0_i32_0 = arith.constant 0 : i32
    %c0_i32_1 = arith.constant 0 : i32
    return %c0_i32, %c0_i32_0 : i32, i32
  }
  func.func @transform_5(%arg0: i32) -> (i32, i32, i32) {
    %c0_i32 = arith.constant 0 : i32
    %c0_i32_0 = arith.constant 0 : i32
    %c0_i32_1 = arith.constant 0 : i32
    return %arg0, %c0_i32, %c0_i32_0 : i32, i32, i32
  }
}

</mosaic_0001>

<bundles_post_ra>
// kernel: channel_wise_forward.1
= control target key start
LH: loop header
LB: loop body
LE: loop exit
PB: predicated region body
PF: predicated region fallthrough
CT: control target
= control target key end

     0   :  { %s972_s18 = smov 0   ;;  %s1189_s0 = inlined_call_operand.vmem [shape: f32[2,64,128], index: 0, kind: input, shape index: {}]   ;;  %s1190_s1 = inlined_call_operand.vmem [shape: f32[128,128], index: 1, kind: input, shape index: {}]   ;;  %s1191_s2 = inlined_call_operand.vmem [shape: f32[128,128], index: 2, kind: input, shape index: {}]   ;;  %s1192_s3 = inlined_call_operand.vmem [shape: f32[64,1], index: 3, kind: input, shape index: {}]   ;;  %s1193_s4 = inlined_call_operand.vmem [shape: f32[64,1], index: 4, kind: input, shape index: {}]   ;;  %s1194_s5 = inlined_call_operand.vmem [shape: f32[2,64,128], index: 5, kind: output, shape index: {}]  }
   0x1 LB: > { %s707_s19 = sadd.s32 4294967295, %s939_s18   ;;  %p711_p0 = scmp.ge.s32.totalorder %s939_s18, 1  ;;  %s939_s18 = sphi %s972_s18, %s15_s18  }
   0x2   : > { %p187_p1 = scmp.lt.s32.totalorder %s939_s18, 3 }
   0x4   : > { %p188_p2 = pnand %p711_p0, %p187_p1 }
   0x5   : > { %v233_v0 = vld [vmem:[%s1190_s1] sm:$0xff] (!%p188_p2)  ;;  %v234_v1 = vld [vmem:[%s1190_s1 + $0x8] sm:$0xff] (!%p188_p2)  ;;  %v235_v2 = vld [vmem:[%s1190_s1 + $0x10] sm:$0xff] (!%p188_p2)  ;;  %p215_p3 = scmp.lt.s32.totalorder (!%p188_p2), %s707_s19, 1  ;;  %v941_v58 = vmov (!%p188_p2), 0  }
   0x6   : > { %191 = sbr.rel (%p188_p2) target bundleno = 526 (0x20e), region = 40  ;;  %v856_v3 = vpack.c.bf16 (!%p188_p2), %v234_v1, %v233_v0  ;;  %v236_v4 = vld [vmem:[%s1190_s1 + $0x18] sm:$0xff] (!%p188_p2)  ;;  %v237_v6 = vld [vmem:[%s1190_s1 + $0x20] sm:$0xff] (!%p188_p2)  ;;  %v238_v7 = vld [vmem:[%s1190_s1 + $0x28] sm:$0xff] (!%p188_p2)  ;;  %930 = vset.pattern.permute.xlu1 (!%p188_p2), %v941_v58  ;;  %929 = vset.pattern.permute.xlu0 (!%p188_p2), %v941_v58 }
   0x7   : > { %v860_v5 = vpack.c.bf16 (!%p188_p2), %v236_v4, %v235_v2  ;;  %v864_v8 = vpack.c.bf16 (!%p188_p2), %v238_v7, %v237_v6  ;;  %v354_v9 = vld [vmem:[%s1191_s2] sm:$0xff] (!%p188_p2)  ;;  %v355_v10 = vld [vmem:[%s1191_s2 + $0x8] sm:$0xff] (!%p188_p2)  ;;  %v239_v11 = vld [vmem:[%s1190_s1 + $0x30] sm:$0xff] (!%p188_p2) }
   0x8   : > { %857 = vmatprep.subr.bf16.mxu0 (!%p188_p2), %v856_v3  ;;  %v240_v12 = vld [vmem:[%s1190_s1 + $0x38] sm:$0xff] (!%p188_p2)  ;;  %v888_v14 = vpack.c.bf16 (!%p188_p2), %v355_v10, %v354_v9  ;;  %v356_v15 = vld [vmem:[%s1191_s2 + $0x10] sm:$0xff] (!%p188_p2)  ;;  %v358_v18 = vld [vmem:[%s1191_s2 + $0x20] sm:$0xff] (!%p188_p2) }
   0x9   : > { %859 = vmatpush3.bf16.msra.mxu0 (!%p188_p2), %v856_v3  ;;  %v868_v16 = vpack.c.bf16 (!%p188_p2), %v240_v12, %v239_v11  ;;  %v357_v17 = vld [vmem:[%s1191_s2 + $0x18] sm:$0xff] (!%p188_p2)  ;;  %v359_v19 = vld [vmem:[%s1191_s2 + $0x28] sm:$0xff] (!%p188_p2)  ;;  %v241_v20 = vld [vmem:[%s1190_s1 + $0x40] sm:$0xff] (!%p188_p2) }
   0xa   : > { %861 = vmatprep.subr.bf16.mxu0 (!%p188_p2), %v860_v5  ;;  %889 = vmatprep.subr.bf16.mxu1 (!%p188_p2), %v888_v14  ;;  %v242_v21 = vld [vmem:[%s1190_s1 + $0x48] sm:$0xff] (!%p188_p2)  ;;  %v892_v22 = vpack.c.bf16 (!%p188_p2), %v357_v17, %v356_v15  ;;  %v896_v23 = vpack.c.bf16 (!%p188_p2), %v359_v19, %v358_v18  ;;  %v360_v24 = vld [vmem:[%s1191_s2 + $0x30] sm:$0xff] (!%p188_p2)  ;;  %v361_v25 = vld [vmem:[%s1191_s2 + $0x38] sm:$0xff] (!%p188_p2) }
   0xb   : > { %891 = vmatpush3.bf16.msra.mxu1 (!%p188_p2), %v888_v14  ;;  %v872_v26 = vpack.c.bf16 (!%p188_p2), %v242_v21, %v241_v20  ;;  %v243_v27 = vld [vmem:[%s1190_s1 + $0x50] sm:$0xff] (!%p188_p2)  ;;  %v244_v28 = vld [vmem:[%s1190_s1 + $0x58] sm:$0xff] (!%p188_p2)  ;;  %v900_v29 = vpack.c.bf16 (!%p188_p2), %v361_v25, %v360_v24  ;;  %v362_v30 = vld [vmem:[%s1191_s2 + $0x40] sm:$0xff] (!%p188_p2) }
   0xc   : > { %893 = vmatprep.subr.bf16.mxu1 (!%p188_p2), %v892_v22  ;;  %v363_v31 = vld [vmem:[%s1191_s2 + $0x48] sm:$0xff] (!%p188_p2)  ;;  %v876_v32 = vpack.c.bf16 (!%p188_p2), %v244_v28, %v243_v27  ;;  %v245_v33 = vld [vmem:[%s1190_s1 + $0x60] sm:$0xff] (!%p188_p2)  ;;  %v364_v36 = vld [vmem:[%s1191_s2 + $0x50] sm:$0xff] (!%p188_p2) }
   0xd   : > { %s1196_s19 = smov (!%p215_p3, %s707_s19), 1  ;;  %863 = vmatpush3.bf16.msra.mxu0 %v860_v5  ;;  %v246_v34 = vld [vmem:[%s1190_s1 + $0x68] sm:$0xff]  ;;  %v904_v35 = vpack.c.bf16 %v363_v31, %v362_v30  ;;  %v365_v37 = vld [vmem:[%s1191_s2 + $0x58] sm:$0xff]  ;;  %v247_v39 = vld [vmem:[%s1190_s1 + $0x70] sm:$0xff] }
   0xe   : > { %s718_s7 = sshll.u32 %s1196_s19, 6  ;;  %865 = vmatprep.subr.bf16.mxu0 %v864_v8  ;;  %v880_v38 = vpack.c.bf16 %v246_v34, %v245_v33  ;;  %v248_v40 = vld [vmem:[%s1190_s1 + $0x78] sm:$0xff]  ;;  %v908_v41 = vpack.c.bf16 %v365_v37, %v364_v36  ;;  %v366_v42 = vld [vmem:[%s1191_s2 + $0x60] sm:$0xff]  ;;  %v367_v43 = vld [vmem:[%s1191_s2 + $0x68] sm:$0xff] }
   0xf   : > { %s1006_s10 = scalar_lea.vmem %s1189_s0, %s718_s7  ;;  %895 = vmatpush3.bf16.msra.mxu1 %v892_v22  ;;  %v884_v44 = vpack.c.bf16 %v248_v40, %v247_v39  ;;  %v912_v45 = vpack.c.bf16 %v367_v43, %v366_v42  ;;  %v368_v46 = vld [vmem:[%s1191_s2 + $0x70] sm:$0xff]  ;;  %v369_v47 = vld [vmem:[%s1191_s2 + $0x78] sm:$0xff]  ;;  %v532_v57 = vld [vmem:[%s1192_s3] sm:$0xff]  ;;  %s224_s11 = scalar_lea.vmem %s1194_s5, %s718_s7 }
  0x10   : > { %v225_v13 = vld [vmem:[%s1006_s10] sm:$0xff]  ;;  %897 = vmatprep.subr.bf16.mxu1 %v896_v23  ;;  %v916_v48 = vpack.c.bf16 %v369_v47, %v368_v46  ;;  %v226_v49 = vld [vmem:[%s1006_s10 + $0x8] sm:$0xff]  ;;  %v227_v50 = vld [vmem:[%s1006_s10 + $0x10] sm:$0xff]  ;;  %542 = vperm.xlu0 %929, %v532_v57  }
  0x11   : > { %800 = vmatprep.mubr.f32.mxu0 %v225_v13  ;;  %867 = vmatpush3.bf16.msra.mxu0 %v864_v8  ;;  %v228_v51 = vld [vmem:[%s1006_s10 + $0x18] sm:$0xff]  ;;  %v229_v52 = vld [vmem:[%s1006_s10 + $0x20] sm:$0xff]  ;;  %v230_v53 = vld [vmem:[%s1006_s10 + $0x28] sm:$0xff] }
  0x12   : > { %869 = vmatprep.subr.bf16.mxu0 %v868_v16  ;;  %v231_v54 = vld [vmem:[%s1006_s10 + $0x30] sm:$0xff]  ;;  %v232_v55 = vld [vmem:[%s1006_s10 + $0x38] sm:$0xff]  ;;  %v533_v60 = vld [vmem:[%s1192_s3 + $0x8] sm:$0xff] }
  0x13   : > { %899 = vmatpush3.bf16.msra.mxu1 %v896_v23  ;;  %v534_v56 = vld [vmem:[%s1192_s3 + $0x10] sm:$0xff]  ;;  %v535_v59 = vld [vmem:[%s1192_s3 + $0x18] sm:$0xff]  ;;  %v537_v61 = vld [vmem:[%s1192_s3 + $0x28] sm:$0xff] }
  0x14   : > { %901 = vmatprep.subr.bf16.mxu1 %v900_v29  ;;  %552 = vperm.xlu1 %930, %v534_v56   ;;  %v536_v62 = vld [vmem:[%s1192_s3 + $0x20] sm:$0xff]  ;;  %v539_v63 = vld [vmem:[%s1192_s3 + $0x38] sm:$0xff]  ;;  %v538_v0 = vld [vmem:[%s1192_s3 + $0x30] sm:$0xff] }
  0x15   : > { %871 = vmatpush3.bf16.msra.mxu0 %v868_v16  ;;  %547 = vperm.xlu0 %929, %v533_v60   ;;  %v589_v1 = vld [vmem:[%s1193_s4 + $0x8] sm:$0xff]  ;;  %v588_v2 = vld [vmem:[%s1193_s4] sm:$0xff]  ;;  %v591_v3 = vld [vmem:[%s1193_s4 + $0x18] sm:$0xff] }
  0x16   : > { %873 = vmatprep.subr.bf16.mxu0 %v872_v26  ;;  %v590_v4 = vld [vmem:[%s1193_s4 + $0x10] sm:$0xff]  ;;  %v593_v5 = vld [vmem:[%s1193_s4 + $0x28] sm:$0xff]  ;;  %v592_v6 = vld [vmem:[%s1193_s4 + $0x20] sm:$0xff] }
  0x17   : > { %903 = vmatpush3.bf16.msra.mxu1 %v900_v29  ;;  %v595_v7 = vld [vmem:[%s1193_s4 + $0x38] sm:$0xff]  ;;  %v594_v8 = vld [vmem:[%s1193_s4 + $0x30] sm:$0xff] }
  0x18   : > { %905 = vmatprep.subr.bf16.mxu1 %v904_v35  ;;  %557 = vperm.xlu1 %930, %v535_v59  }
  0x19   : > { %875 = vmatpush3.bf16.msra.mxu0 %v872_v26  ;;  %562 = vperm.xlu0 %929, %v536_v62  }
  0x1a   : > { %877 = vmatprep.subr.bf16.mxu0 %v876_v32 }
  0x1b   : > { %907 = vmatpush3.bf16.msra.mxu1 %v904_v35 }
  0x1c   : > { %909 = vmatprep.subr.bf16.mxu1 %v908_v41  ;;  %567 = vperm.xlu1 %930, %v537_v61  }
  0x1d   : > { %879 = vmatpush3.bf16.msra.mxu0 %v876_v32  ;;  %572 = vperm.xlu0 %929, %v538_v0  }
  0x1e   : > { %881 = vmatprep.subr.bf16.mxu0 %v880_v38 }
  0x1f   : > { %911 = vmatpush3.bf16.msra.mxu1 %v908_v41 }
  0x20   : > { %913 = vmatprep.subr.bf16.mxu1 %v912_v45  ;;  %577 = vperm.xlu1 %930, %v539_v63  }
  0x21   : > { %883 = vmatpush3.bf16.msra.mxu0 %v880_v38  ;;  %598 = vperm.xlu0 %929, %v588_v2  }
  0x22   : > { %885 = vmatprep.subr.bf16.mxu0 %v884_v44 }
  0x23   : > { %915 = vmatpush3.bf16.msra.mxu1 %v912_v45 }
  0x24   : > { %917 = vmatprep.subr.bf16.mxu1 %v916_v48  ;;  %603 = vperm.xlu1 %930, %v589_v1  }
  0x25   : > { %887 = vmatpush3.bf16.msra.mxu0 %v884_v44  ;;  %608 = vperm.xlu0 %929, %v590_v4  }
  0x27   : > { %919 = vmatpush3.bf16.msra.mxu1 %v916_v48 }
  0x28   : > { %801 = vmatmul.mubr.f32.vlgmr.msra.gmra.mrb[0].mxu0 %v226_v49  ;;  %613 = vperm.xlu1 %930, %v591_v3  }
  0x29   : > { %803 = vmatprep.mubr.f32.mxu0 %v227_v50  ;;  %618 = vperm.xlu0 %929, %v592_v6  }
  0x2c   : > { %804 = vmatmul.mubr.f32.gmra.mrb[2].mxu0 %v228_v51  ;;  %623 = vperm.xlu1 %930, %v593_v5  }
  0x2d   : > { %806 = vmatprep.mubr.f32.mxu0 %v229_v52  ;;  %628 = vperm.xlu0 %929, %v594_v8  }
  0x30   : > { %807 = vmatmul.mubr.f32.gmra.mrb[4].mxu0 %v230_v53  ;;  %633 = vperm.xlu1 %930, %v595_v7  }
  0x31   : > { %809 = vmatprep.mubr.f32.mxu0 %v231_v54 }
  0x34   : > { %810 = vmatmul.mubr.f32.gmra.mrb[6].mxu0 %v232_v55 }
  0x8f   : > { %v1169_v35 = vpop.permute.xlu0 %542 }
  0x93   : > { %v553_v40 = vpop.permute.xlu1 %552 }
  0x94   : > { %v548_v48 = vpop.permute.xlu0 %547 }
  0x97   : > { %v558_v51 = vpop.permute.xlu1 %557 }
  0x98   : > { %v563_v56 = vpop.permute.xlu0 %562 }
  0x9b   : > { %v568_v59 = vpop.permute.xlu1 %567 }
  0x9c   : > { %v573_v0 = vpop.permute.xlu0 %572 }
  0x9f   : > { %v578_v3 = vpop.permute.xlu1 %577 }
  0xfb   : > { %v802_v9 = vpop.f32.mrb[0].mxu0 }
  0xfc   : > { %v315_v10 = vpop.f32.mrb[1].mxu0 }
  0xfd   : > { %844 = vmatprep.mubr.f32.mxu1 %v315_v10 }
  0xfe   : > { %845 = vmatmul.mubr.f32.vlgmr.msra.gmra.mrb[0].mxu1 %v802_v9 }
  0xff   : > { %v805_v11 = vpop.f32.mrb[2].mxu0 }
 0x100   : > { %v325_v12 = vpop.f32.mrb[3].mxu0 }
 0x101   : > { %847 = vmatprep.mubr.f32.mxu1 %v325_v12 }
 0x102   : > { %848 = vmatmul.mubr.f32.gmra.mrb[2].mxu1 %v805_v11 }
 0x103   : > { %v808_v13 = vpop.f32.mrb[4].mxu0 }
 0x104   : > { %v335_v14 = vpop.f32.mrb[5].mxu0 }
 0x105   : > { %850 = vmatprep.mubr.f32.mxu1 %v335_v14 }
 0x106   : > { %851 = vmatmul.mubr.f32.gmra.mrb[4].mxu1 %v808_v13 }
 0x107   : > { %v811_v15 = vpop.f32.mrb[6].mxu0 }
 0x108   : > { %v345_v16 = vpop.f32.mrb[7].mxu0 }
 0x109   : > { %853 = vmatprep.mubr.f32.mxu1 %v345_v16  ;;  %v599_v16 = vpop.permute.xlu0 %598 }
 0x10a   : > { %854 = vmatmul.mubr.f32.gmra.mrb[6].mxu1 %v811_v15 }
 0x1d1   : > { %v1142_v17 = vpop.f32.mrb[0].mxu1 }
 0x1d2   : > { %v489_v18 = vmul.f32 %v1142_v17, %v1142_v17  ;;  %v1146_v19 = vpop.f32.mrb[1].mxu1 }
 0x1d3   : > { %v475_v20 = vadd.f32 %v1142_v17, %v1146_v19  ;;  %v488_v21 = vmul.f32 %v1146_v19, %v1146_v19 }
 0x1d5   : > { %v496_v22 = vadd.f32 %v489_v18, %v488_v21  ;;  %v1152_v23 = vpop.f32.mrb[2].mxu1  ;;  %v604_v18 = vpop.permute.xlu1 %603 }
 0x1d6   : > { %v1154_v24 = vpop.f32.mrb[3].mxu1  ;;  %v491_v27 = vmul.f32 %v1152_v23, %v1152_v23  ;;  %v609_v21 = vpop.permute.xlu0 %608 }
 0x1d7   : > { %v476_v25 = vadd.f32 %v475_v20, %v1154_v24  ;;  %v490_v26 = vmul.f32 %v1154_v24, %v1154_v24 }
 0x1d9   : > { %v497_v28 = vadd.f32 %v496_v22, %v490_v26  ;;  %v1161_v29 = vpop.f32.mrb[4].mxu1  ;;  %v477_v30 = vadd.f32 %v1152_v23, %v476_v25  ;;  %v614_v22 = vpop.permute.xlu1 %613 }
 0x1da   : > { %v1164_v31 = vpop.f32.mrb[5].mxu1  ;;  %v493_v36 = vmul.f32 %v1161_v29, %v1161_v29 }
 0x1db   : > { %v478_v32 = vadd.f32 %v477_v30, %v1164_v31  ;;  %v492_v33 = vmul.f32 %v1164_v31, %v1164_v31  ;;  %v498_v34 = vadd.f32 %v497_v28, %v491_v27 }
 0x1dd   : > { %v499_v37 = vadd.f32 %v498_v34, %v492_v33  ;;  %v855_v38 = vpop.f32.mrb[6].mxu1  ;;  %v479_v39 = vadd.f32 %v1161_v29, %v478_v32 }
 0x1de   : > { %v466_v41 = vpop.f32.mrb[7].mxu1  ;;  %v495_v45 = vmul.f32 %v855_v38, %v855_v38 }
 0x1df   : > { %v480_v42 = vadd.f32 %v479_v39, %v466_v41  ;;  %v494_v43 = vmul.f32 %v466_v41, %v466_v41  ;;  %v500_v44 = vadd.f32 %v499_v37, %v493_v36 }
 0x1e1   : > { %v481_v46 = vadd.f32 %v855_v38, %v480_v42  ;;  %v501_v47 = vadd.f32 %v500_v44, %v494_v43 }
 0x1e3   : > { %v482_v49 = vrot.slane %v481_v46, 4  ;;  %v502_v50 = vadd.f32 %v501_v47, %v495_v45 }
 0x1e5   : > { %v483_v52 = vadd.f32 %v482_v49, %v481_v46  ;;  %v503_v53 = vrot.slane %v502_v50, 4 }
 0x1e7   : > { %v484_v54 = vrot.slane %v483_v52, 2  ;;  %v504_v55 = vadd.f32 %v503_v53, %v502_v50 }
 0x1e9   : > { %v485_v57 = vadd.f32 %v484_v54, %v483_v52  ;;  %v505_v58 = vrot.slane %v504_v55, 2 }
 0x1eb   : > { %v486_v60 = vrot.slane %v485_v57, 1  ;;  %v506_v61 = vadd.f32 %v505_v58, %v504_v55 }
 0x1ed   : > { %v487_v62 = vadd.f32 %v486_v60, %v485_v57  ;;  %v507_v63 = vrot.slane %v506_v61, 1 }
 0x1ef   : > { %v508_v1 = vadd.f32 %v507_v63, %v506_v61  ;;  %v509_v2 = vmul.f32 0.015625, %v487_v62 }
 0x1f1   : > { %v510_v4 = vmul.f32 0.015625, %v508_v1  ;;  %v511_v5 = vmul.f32 %v509_v2, %v509_v2  ;;  %v520_v6 = vsub.f32 %v466_v41, %v509_v2  ;;  %v515_v7 = vsub.f32 %v1142_v17, %v509_v2  ;;  %v619_v17 = vpop.permute.xlu0 %618 }
 0x1f2   : > { %v514_v8 = vsub.f32 %v1146_v19, %v509_v2  ;;  %v517_v9 = vsub.f32 %v1152_v23, %v509_v2  ;;  %v516_v10 = vsub.f32 %v1154_v24, %v509_v2  ;;  %v519_v11 = vsub.f32 %v1161_v29, %v509_v2  ;;  %v624_v19 = vpop.permute.xlu1 %623 }
 0x1f3   : > { %v512_v12 = vsub.f32 %v510_v4, %v511_v5  ;;  %v518_v13 = vsub.f32 %v1164_v31, %v509_v2  ;;  %v521_v14 = vsub.f32 %v855_v38, %v509_v2 }
 0x1f5   : > { %v513_v15 = vmax.f32 %v512_v12, 0.0  ;;  %v629_v42 = vpop.permute.xlu0 %628 }
 0x1f6   : > { %v634_v46 = vpop.permute.xlu1 %633 }
 0x1f7   : > { %v522_v20 = vadd.f32 1e-05, %v513_v15 }
 0x1f9   : > { %931 = vrsqrt.f32 %v522_v20 }
 0x203   : > { %v932_v25 = vpop.eup %931 }
 0x204   : > { %v530_v23 = vmul.f32 %v932_v25, %v520_v6  ;;  %v525_v26 = vmul.f32 %v932_v25, %v515_v7  ;;  %v524_v24 = vmul.f32 %v932_v25, %v514_v8  ;;  %v527_v27 = vmul.f32 %v932_v25, %v517_v9 }
 0x205   : > { %v526_v28 = vmul.f32 %v932_v25, %v516_v10  ;;  %v529_v29 = vmul.f32 %v932_v25, %v519_v11  ;;  %v528_v30 = vmul.f32 %v932_v25, %v518_v13  ;;  %v531_v31 = vmul.f32 %v932_v25, %v521_v14 }
 0x206   : > { %v581_v32 = vmul.f32 %v548_v48, %v525_v26  ;;  %v580_v33 = vmul.f32 %v1169_v35, %v524_v24  ;;  %v583_v34 = vmul.f32 %v558_v51, %v527_v27  ;;  %v586_v36 = vmul.f32 %v573_v0, %v530_v23 }
 0x207   : > { %v582_v37 = vmul.f32 %v553_v40, %v526_v28  ;;  %v585_v38 = vmul.f32 %v568_v59, %v529_v29  ;;  %v584_v39 = vmul.f32 %v563_v56, %v528_v30  ;;  %v587_v41 = vmul.f32 %v578_v3, %v531_v31 }
 0x208   : > { %v637_v43 = vadd.f32 %v604_v18, %v581_v32  ;;  %v636_v44 = vadd.f32 %v599_v16, %v580_v33  ;;  %v639_v45 = vadd.f32 %v614_v22, %v583_v34  ;;  %v642_v47 = vadd.f32 %v629_v42, %v586_v36 }
 0x209   : > { %v638_v48 = vadd.f32 %v609_v21, %v582_v37  ;;  %v641_v49 = vadd.f32 %v624_v19, %v585_v38  ;;  %v640_v35 = vadd.f32 %v619_v17, %v584_v39  ;;  %v643_v50 = vadd.f32 %v634_v46, %v587_v41 }
 0x20a   : > { %645 = vst [vmem:[%s224_s11 + $0x8] sm:$0xff] %v637_v43  ;;  %644 = vst [vmem:[%s224_s11] sm:$0xff] %v636_v44 }
 0x20b   : > { %647 = vst [vmem:[%s224_s11 + $0x18] sm:$0xff] %v639_v45  ;;  %650 = vst [vmem:[%s224_s11 + $0x30] sm:$0xff] %v642_v47 }
 0x20c   : > { %646 = vst [vmem:[%s224_s11 + $0x10] sm:$0xff] %v638_v48  ;;  %649 = vst [vmem:[%s224_s11 + $0x28] sm:$0xff] %v641_v49 }
 0x20d   : > { %648 = vst [vmem:[%s224_s11 + $0x20] sm:$0xff] %v640_v35  ;;  %651 = vst [vmem:[%s224_s11 + $0x38] sm:$0xff] %v643_v50 }
 0x20e PF: > { %s15_s18 = sadd.s32 1, %s939_s18  }
 0x20f   : > { %p12_p4 = scmp.ge.s32.totalorder %s15_s18, 4  }
 0x211   :  { %14 = sbr.rel (!%p12_p4) target bundleno = 1 (0x1), region = 70 }

</bundles_post_ra>
